<compile_context>
chip_gen: v5e
topology: v5e:2x2
jax: 0.10.0
libtpu: 0.0.40
codegen_flags: <defaults>
</compile_context>

<pallas_src>
import math
import functools

import jax
import jax.numpy as jnp
from jax.experimental import pallas as pl
from jax.experimental.pallas import tpu as pltpu

_LANE = 128
_PER_BUF_TARGET = 8 << 20    # ~8 MiB per emb/out tile buffer (HBM-roofline sweet spot)


def _build_pe(max_len: int, dim: int) -> jnp.ndarray:
    """Deterministic sinusoidal positional-encoding table (max_len, dim), f32."""
    position = jnp.arange(0, max_len, dtype=jnp.float32)[:, None]            # (L, 1)
    div_term = jnp.exp(
        jnp.arange(0, dim, 2, dtype=jnp.float32) * -(math.log(10000.0) / dim)
    )                                                                         # (D/2,)
    angles = position * div_term                                              # (L, D/2)
    pe = jnp.zeros((max_len, dim), dtype=jnp.float32)
    pe = pe.at[:, 0::2].set(jnp.sin(angles))
    pe = pe.at[:, 1::2].set(jnp.cos(angles))
    return pe


def _pe_kernel(emb_ref, pe_ref, out_ref, *, scale):
    # emb_ref/out_ref: (tb, tr, C); pe_ref: (tr, C) f32 (broadcast over tb).
    # Compute in f32 in-register regardless of input dtype; cast on store.
    e = emb_ref[...].astype(jnp.float32)
    p = pe_ref[...].astype(jnp.float32)
    out_ref[...] = (e * scale + p).astype(out_ref.dtype)


def _round_up(x: int, m: int) -> int:
    return ((x + m - 1) // m) * m


def _vmem_capacity_bytes() -> int:
    try:
        cap = int(pltpu.get_tpu_info().vmem_capacity_bytes)
        if cap > 0:
            return cap
    except Exception:
        pass
    return 64 << 20  # conservative default (v7x per-TensorCore VMEM)


def _choose_tiles(B: int, R: int, C: int, itemsize: int):
    """Pick (row_tile, batch_tile, n_row_tiles, n_batch_tiles, vmem_limit)."""
    cap = _vmem_capacity_bytes()
    total_budget = (cap * 7) // 10                       # headroom under the limit
    # Per-row VMEM cost of one grid step at tb=1: 2x emb-in + 2x out buffers
    # (emb dtype) + 2x pe buffers (f32) -- pe is double-buffered too.
    row_cost = C * (4 * itemsize + 2 * 4)
    rows_budget = max(8, total_budget // max(1, row_cost))
    rows_cap = max(8, _PER_BUF_TARGET // max(1, C * itemsize))
    rows_target = min(rows_budget, rows_cap)

    R8 = _round_up(R, 8)
    if R < 8:
        tr = R                                           # full extent (pe sliced to match)
    else:
        tr = max(8, (min(rows_target, R) // 8) * 8)      # multiple of 8, <= R

    # Block several batch slabs per step when a single (tr, C) tile is small.
    tb = 1
    if B > 1 and rows_target >= 2 * R8:
        tb = min(B, max(1, rows_target // R8))
        while tb > 1 and B % tb != 0:                    # keep batch blocks exact
            tb -= 1

    n_row = pl.cdiv(R, tr)
    n_batch = pl.cdiv(B, tb)

    # Feed both v7x TensorCores: at least 2 steps on the parallel grid.
    if n_row * n_batch == 1:
        if tb > 1:
            tb = tb // 2
            while tb > 1 and B % tb != 0:
                tb -= 1
            n_batch = pl.cdiv(B, tb)
        elif R >= 16 and tr > 8:
            tr = _round_up(R // 2, 8)
            n_row = pl.cdiv(R, tr)

    vmem_limit = (cap * 3) // 4
    return tr, tb, n_row, n_batch, vmem_limit


def positional_encoding_forward(emb: jnp.ndarray, pe: jnp.ndarray,
                                dim: int) -> jnp.ndarray:
    """emb: (B, S, D); pe: (max_len, D) f32 table. Returns (B, S, D)."""
    B, S, D = emb.shape
    assert D == dim
    scale = float(math.sqrt(dim))
    max_len = pe.shape[0]

    # Lane-dense 2-D view of each (S, D) slab.
    if D % _LANE != 0 and (S * D) % _LANE == 0:
        R, C = (S * D) // _LANE, _LANE                   # fold seq into lanes
        fold = True
    else:
        R, C = S, D
        fold = False
    emb2 = emb.reshape(B, R, C)

    # Positional-table view: pass the FULL table (no per-call slice/cast) when
    # legal; the BlockSpec bounds the read. Keep it f32 (kernel computes f32).
    if not fold:
        pe2 = pe                                          # (max_len, D)
        pe_rows = max_len
    elif (max_len * D) % _LANE == 0:
        pe_rows = (max_len * D) // _LANE
        pe2 = pe.reshape(pe_rows, _LANE)                  # layout-preserving reshape
    else:
        pe2 = pe[:S].reshape(R, C)                        # rare fallback: tiny slice
        pe_rows = R

    itemsize = jnp.dtype(emb.dtype).itemsize
    tr, tb, n_row, n_batch, vmem_limit = _choose_tiles(B, R, C, itemsize)

    # Legality: the pe block's sublane dim must be a multiple of 8 or equal the
    # full pe row extent. tr % 8 != 0 only happens for tiny R (< 8), where we
    # slice the table to exactly R rows (negligible cost).
    if tr % 8 != 0 and tr != pe_rows:
        pe2 = pe2[:R]
        pe_rows = R

    kernel = functools.partial(_pe_kernel, scale=scale)

    out = pl.pallas_call(
        kernel,
        out_shape=jax.ShapeDtypeStruct((B, R, C), emb.dtype),
        grid_spec=pltpu.PrefetchScalarGridSpec(
            num_scalar_prefetch=0,
            # Row-tile axis OUTER, batch inner: pe block index is constant
            # across the inner batch loop => pe stays resident, no re-DMA.
            grid=(n_row, n_batch),
            in_specs=[
                pl.BlockSpec((tb, tr, C), lambda r, b: (b, r, 0)),
                pl.BlockSpec((tr, C), lambda r, b: (r, 0)),
            ],
            out_specs=pl.BlockSpec((tb, tr, C), lambda r, b: (b, r, 0)),
        ),
        compiler_params=pltpu.CompilerParams(
            # Two parallel axes keep both v7x TensorCores fed even for small B.
            dimension_semantics=("parallel", "parallel"),
            # Generation-aware limit (~75% of this chip's VMEM capacity).
            vmem_limit_bytes=int(vmem_limit),
        ),
    )(emb2, pe2)

    return out.reshape(B, S, D)
    # TODO(synk): training-mode dropout (nn.Dropout(p)) not applied; eval-mode
    # dropout is identity, which is what this kernel reproduces. The step!=None
    # single-position path is also not implemented (step=None only).


if __name__ == "__main__":
    # Small, module-consistent shapes: batch=2, seq=8, hidden dim=32.
    B, S, D = 2, 8, 32
    MAX_LEN = 64
    dropout_p = 0.1  # unused at inference

    key = jax.random.PRNGKey(0)
    emb = jax.random.normal(key, (B, S, D), dtype=jnp.float32)

    pe = _build_pe(MAX_LEN, D)

    out = positional_encoding_forward(emb, pe, D)
    out = jax.block_until_ready(out)

    # Correctness check against a plain-JAX reference of the PyTorch forward.
    ref = emb * math.sqrt(D) + pe[None, :S, :]
    assert out.shape == (B, S, D)
    assert jnp.allclose(out, ref, atol=1e-5, rtol=1e-5)

    print("KERNEL_OK")
</pallas_src>

<mosaic_0001>
module attributes {stable_mosaic.version = 11 : i64} {
  func.func @_pe_kernel(%arg0: i32, %arg1: i32, %arg2: memref<1x2x128xf32, #tpu.memory_space<vmem>>, %arg3: memref<2x128xf32, #tpu.memory_space<vmem>>, %arg4: memref<1x2x128xf32, #tpu.memory_space<vmem>>) attributes {dimension_semantics = [#tpu.dimension_semantics<parallel>, #tpu.dimension_semantics<parallel>], iteration_bounds = array<i64: 1, 2>, scalar_prefetch = 0 : i64, scratch_operands = 0 : i64, tpu.core_type = #tpu.core_type<tc>, window_params = [{transform_indices = @transform_0, window_bounds = array<i64: 1, 2, 128>}, {transform_indices = @transform_1, window_bounds = array<i64: 2, 128>}, {transform_indices = @transform_2, window_bounds = array<i64: 1, 2, 128>}]} {
    %c0 = arith.constant 0 : index
    %c0_0 = arith.constant 0 : index
    %c0_1 = arith.constant 0 : index
    %0 = vector.load %arg2[%c0, %c0_0, %c0_1] : memref<1x2x128xf32, #tpu.memory_space<vmem>>, vector<1x2x128xf32>
    %c0_2 = arith.constant 0 : index
    %c0_3 = arith.constant 0 : index
    %1 = vector.load %arg3[%c0_2, %c0_3] : memref<2x128xf32, #tpu.memory_space<vmem>>, vector<2x128xf32>
    %cst = arith.constant 5.65685415 : f32
    %2 = vector.broadcast %cst : f32 to vector<1x2x128xf32>
    %3 = arith.mulf %0, %2 : vector<1x2x128xf32>
    %4 = vector.shape_cast %1 : vector<2x128xf32> to vector<1x2x128xf32>
    %5 = arith.addf %3, %4 : vector<1x2x128xf32>
    %c0_4 = arith.constant 0 : index
    %c0_5 = arith.constant 0 : index
    %c0_6 = arith.constant 0 : index
    %6 = vector.load %arg4[%c0_4, %c0_5, %c0_6] : memref<1x2x128xf32, #tpu.memory_space<vmem>>, vector<1x2x128xf32>
    tpu.vector_store %arg4[%c0_4, %c0_5, %c0_6], %5 {strides = array<i32>} : memref<1x2x128xf32, #tpu.memory_space<vmem>>, vector<1x2x128xf32>,
    return
  }
  func.func @transform_0(%arg0: i32, %arg1: i32) -> (i32, i32, i32) {
    %c0_i32 = arith.constant 0 : i32
    %c0_i32_0 = arith.constant 0 : i32
    return %arg1, %arg0, %c0_i32 : i32, i32, i32
  }
  func.func @transform_1(%arg0: i32, %arg1: i32) -> (i32, i32) {
    %c0_i32 = arith.constant 0 : i32
    %c0_i32_0 = arith.constant 0 : i32
    return %arg0, %c0_i32 : i32, i32
  }
  func.func @transform_2(%arg0: i32, %arg1: i32) -> (i32, i32, i32) {
    %c0_i32 = arith.constant 0 : i32
    %c0_i32_0 = arith.constant 0 : i32
    return %arg1, %arg0, %c0_i32 : i32, i32, i32
  }
}

</mosaic_0001>

<bundles_post_ra>
// kernel: tpu_custom_call.1
= control target key start
LH: loop header
LB: loop body
LE: loop exit
PB: predicated region body
PF: predicated region fallthrough
CT: control target
= control target key end

     0   :  { %7 = vsyncpa [#allocation3], 0  ;;  %s715_s0 = inlined_call_operand.hbm [shape: f32[2,2,128], index: 0, kind: input, shape index: {}]   ;;  %s716_s1 = inlined_call_operand.hbm [shape: f32[2,128], index: 1, kind: input, shape index: {}]   ;;  %s717_s2 = inlined_call_operand.hbm [shape: f32[2,2,128], index: 2, kind: output, shape index: {}]  }
   0x1   :  { %9 = vsyncpa [#allocation3 + $0x1], 0 }
   0x2   :  { %10 = vsyncpa [#allocation6], 0 }
   0x3   :  { %11 = vsyncpa [#allocation4], 0 }
   0x4   :  { %13 = vsyncpa [#allocation4 + $0x1], 0  ;;  %s566_s9 = smov 0   ;;  %s568_s10 = smov 0  }
   0x5   :  { %s570_s11 = smov 0   ;;  %s572_s12 = smov 0  }
   0x6   :  { %s574_s13 = smov 0   ;;  %s576_s14 = smov 0  }
   0x7 LB: > { %s314_s15 = sadd.s32 4294967295, %s548_s14   ;;  %s315_s16 = sadd.s32 4294967294, %s548_s14   ;;  %s548_s14 = sphi %s576_s14, %s19_s14   ;;  %s544_s13 = sphi %s574_s13, %s729_s13   ;;  %s540_s12 = sphi %s572_s12, %s728_s12   ;;  %s536_s11 = sphi %s570_s11, %s727_s11   ;;  %s532_s10 = sphi %s568_s10, %s726_s10   ;;  %s528_s9 = sphi %s566_s9, %s725_s9  }
   0x8   : > { %p53_p0 = scmp.ne.s32.totalorder %s532_s10, %s528_s9  ;;  %p600_p1 = scmp.eq.s32.totalorder %s314_s15, 0 }
   0x9   : > { %p604_p2 = scmp.eq.s32.totalorder %s314_s15, 1  ;;  %p111_p3 = scmp.eq.s32.totalorder %s315_s16, 1 }
   0xa   : > { %p610_p4 = por %p600_p1, %p53_p0  ;;  %p316_p5 = scmp.ge.s32.totalorder %s548_s14, 1 }
   0xb   : > { %p615_p6 = por %p111_p3, %p53_p0  ;;  %p118_p7 = scmp.lt.s32.totalorder %s548_s14, 3 }
   0xc   : > { %s132_s23 = sshll.u32 %s716_s1, 4  ;;  %p318_p9 = scmp.ge.s32.totalorder %s548_s14, 2  ;;  %s133_s23 = int_to_ptr.hbm [resolvable:$true] %s132_s23 }
   0xd   : > { %p623_p8 = pnand %p316_p5, %p118_p7  ;;  %s550_s25 = smov [#allocation5]  }
   0xe   : > { %s134_s26 = sshll.u32 %s550_s25, 4  ;;  %s28_s27 = sadd.s32 1, %s544_s13  ;;  %s135_s26 = int_to_ptr.vmem [resolvable:$true] %s134_s26 }
   0xf   : > { %p337_p10 = pneg %p623_p8  ;;  %p29_p12 = scmp.ge.s32.totalorder %s28_s27, 2 }
  0x10   : > { %s40_s28 = sadd.s32 1, %s536_s11  ;;  %p47_p13 = scmp.ne.s32.totalorder %s536_s11, %s532_s10 }
  0x11   : > { %p338_p11 = pnand %p337_p10, %p600_p1  ;;  %p48_p0 = scmp.eq.s32.totalorder %s548_s14, 0 }
  0x12   : > { %s731_s27 = smov (%p29_p12, %s28_s27), 0  ;;  %p645_p5 = por %p604_p2, %p47_p13 }
  0x13   : > { %340 = dma.hbm_to_vmem [thread:$0]  (!%p338_p11), %s133_s23, 32, %s135_s26, [#allocation6]  }
  0x14   : > { %p639_p3 = por %p48_p0, %p47_p13  ;;  %s35_s3 = ssub.s32 %s544_s13, %s731_s27 }
  0x15   : > { %p350_p7 = scmp.lt.s32.totalorder %s548_s14, 2  ;;  %p38_p10 = scmp.eq.s32.totalorder %s35_s3, 0 }
  0x16   : > { %s145_s4 = sand.u32 1, %s536_s11   ;;  %s320_s7 = sshll.u32 %s544_s13, 1 }
  0x17   : > { %s319_s5 = sshll.u32 %s145_s4, 1  ;;  %s154_s16 = scalar_lea.hbm %s715_s0, %s320_s7 }
  0x18   : > { %s654_s6 = scalar_select %p38_p10, %s536_s11, %s40_s28  }
  0x19   : > { %s149_s21 = scalar_lea.vmem [#allocation2], %s319_s5  ;;  %s156_s18 = sshll.u32 %s154_s16, 4  ;;  %s157_s18 = int_to_ptr.hbm [resolvable:$true] %s156_s18 }
  0x1a   : > { %s158_s22 = sshll.u32 %s149_s21, 4  ;;  %p342_p2 = pnand %p350_p7, %p639_p3  ;;  %s159_s22 = int_to_ptr.vmem [resolvable:$true] %s158_s22 }
  0x1b   : > { %s146_s23 = scalar_lea.sflag [#allocation3], %s145_s4  ;;  %167 = sbr.rel (%p623_p8) target bundleno = 50 (0x32), region = 28 }
  0x1c   : > { %344 = dma.hbm_to_vmem [thread:$0]  (!%p342_p2), %s157_s18, 32, %s159_s22, %s146_s23  }
  0x1d   : > { %s665_s25 = sand.u32 (!%p623_p8), 1, %s532_s10  }
  0x1e   : > { %s322_s26 = sshll.u32 (!%p623_p8), %s665_s25, 1  ;;  %s170_s28 = scalar_lea.sflag (!%p623_p8), [#allocation3], %s665_s25 }
  0x1f   : > { %s173_s3 = scalar_lea.vmem (!%p623_p8), [#allocation2], %s322_s26 }
  0x20   : > { %515 = dma.done.wait (%p610_p4), %s170_s28, 32  }
  0x21   : > { %517 = vsyncadd (%p610_p4), %s170_s28, 4294967264 }
  0x22   : > { %519 = dma.done.wait (%p600_p1), [#allocation6], 32  }
  0x23   : > { %521 = vsyncadd (%p600_p1), [#allocation6], 4294967264  ;;  %s326_s24 = sshll.u32 %s540_s12, 1  ;;  %v200_v0 = vld [vmem:[%s173_s3] sm:$0x3]  ;;  %s199_s7 = scalar_lea.vmem [#allocation7], %s322_s26 }
  0x24   : > { %s217_s5 = scalar_lea.hbm %s717_s2, %s326_s24  ;;  %v201_v1 = vld [vmem:[#allocation5] sm:$0x3]  ;;  %s219_s8 = sshll.u32 %s199_s7, 4  ;;  %v202_v2 = vmul.f32 5.656854, %v200_v0  ;;  %s220_s8 = int_to_ptr.vmem [resolvable:$true] %s219_s8 }
  0x25   : > { %s221_s19 = sshll.u32 %s217_s5, 4  ;;  %s206_s17 = scalar_lea.sflag [#allocation4], %s665_s25  ;;  %s222_s19 = int_to_ptr.hbm [resolvable:$true] %s221_s19 }
  0x26   : > { %v203_v3 = vadd.f32 %v202_v2, %v201_v1  ;;  %s476_s15 = sshra.s32 %s222_s19, 4  ;;  %s482_s22 = scalar_lea.hbm %s717_s2, 4  ;;  %s477_s15 = int_to_ptr.hbm [resolvable:$true] %s476_s15 }
  0x27   : > { %s478_s16 = scalar_lea.hbm %s477_s15, 2  ;;  %p483_p11 = scmp.lt.s32.totalorder %s477_s15, %s717_s2 }
  0x28   : > { %204 = vst [vmem:[%s199_s7] sm:$0x3] %v203_v3  ;;  %p479_p1 = scmp.ne.s32.totalorder %s477_s15, %s478_s16  ;;  %p484_p12 = scmp.lt.s32.totalorder %s482_s22, %s478_s16 }
  0x2a   : > { %p480_p4 = pnand %p479_p1, %p645_p5  ;;  %p485_p13 = por %p484_p12, %p483_p11 }
  0x2c   : > { %p481_p8 = pneg %p480_p4 }
  0x2e   : > { %p486_p0 = pnand %p485_p13, %p481_p8 }
  0x30   : > { %489 = shalt.err (!%p486_p0)
}
  0x31   : > { %335 = dma.vmem_to_hbm [thread:$0]  (%p645_p5), %s220_s8, 32, %s222_s19, %s206_s17  }
  0x32 PF: > { %s233_s25 = sand.u32 1, %s528_s9   ;;  %p346_p3 = pnand %p318_p9, %p615_p6 }
  0x33   : > { %s234_s26 = scalar_lea.sflag [#allocation4], %s233_s25 }
  0x34   : > { %p347_p7 = pneg %p346_p3 }
  0x36   : > { %523 = dma.done.wait (%p347_p7), %s234_s26, 32  }
  0x37   : > { %525 = vsyncadd (%p347_p7), %s234_s26, 4294967264  ;;  %s19_s14 = sadd.s32 1, %s548_s14   ;;  %s725_s9 = smov %s532_s10 }
  0x38   : > { %p16_p10 = scmp.ge.s32.totalorder %s19_s14, 4   ;;  %s726_s10 = smov %s536_s11 }
  0x39   : > { %s727_s11 = smov %s654_s6  ;;  %s728_s12 = smov %s544_s13 }
  0x3a   : > { %s729_s13 = smov %s731_s27  ;;  %18 = sbr.rel (!%p16_p10) target bundleno = 7 (0x7), region = 78 }
  0x3f   :  { %240 = vsyncpa [#allocation3], 1 }
  0x40   :  { %242 = vsyncpa [#allocation3 + $0x1], 1 }
  0x41   :  { %243 = vsyncpa [#allocation6], 1 }
  0x42   :  { %244 = vsyncpa [#allocation4], 1 }
  0x43   :  { %246 = vsyncpa [#allocation4 + $0x1], 1 }

</bundles_post_ra>
